<compile_context>
chip_gen: v7x
topology: tpu7x:2x2x1
jax: 0.10.0
libtpu: 0.0.40
codegen_flags: <defaults>
</compile_context>

<pallas_src>
import functools

import jax
import jax.numpy as jnp
from jax.experimental import pallas as pl
from jax.experimental.pallas import tpu as pltpu


def _round_up(x, m):
    return (x + m - 1) // m * m


def _fused_sage_kernel(adj_ref, x_ref, ws1_ref, wn1_ref, b1_ref,
                       ws2_ref, wn2_ref, b2_ref, out_ref,
                       acc_ref, p2_ref, s2_ref, *, tm, tk, in_pad, o_pad):
    layer = pl.program_id(0)   # 0: conv1 (+ReLU + layer-2 pre-projection), 1: conv2
    m = pl.program_id(1)       # output row panel
    k = pl.program_id(2)       # reduction panel over adjacency columns (neighbors)
    nk = pl.num_programs(2)

    @pl.when(k == 0)
    def _():
        acc_ref[...] = jnp.zeros_like(acc_ref)

    a = adj_ref[...]           # (tm, tk) bf16 panel of A_mean

    @pl.when(layer == 0)
    def _():
        row = pl.multiple_of(k * tk, tk)
        xk = x_ref[pl.ds(row, tk), :]                         # (tk, in_pad) bf16
        acc_ref[:, :in_pad] += jnp.dot(a, xk, preferred_element_type=jnp.float32)

    @pl.when(layer == 1)
    def _():
        row = pl.multiple_of(k * tk, tk)
        pk = p2_ref[pl.ds(row, tk), :]                        # (tk, o_pad) bf16
        acc_ref[:, :o_pad] += jnp.dot(a, pk, preferred_element_type=jnp.float32)

    @pl.when((layer == 0) & (k == nk - 1))
    def _():
        # Finalize layer 1 for this row panel (f32 epilogue).
        row = pl.multiple_of(m * tm, tm)
        xm = x_ref[pl.ds(row, tm), :]                         # (tm, in_pad) bf16
        agg = acc_ref[:, :in_pad].astype(jnp.bfloat16)        # (A_mean @ X)[panel m]
        h = jnp.dot(xm, ws1_ref[...], preferred_element_type=jnp.float32)
        h = h + jnp.dot(agg, wn1_ref[...], preferred_element_type=jnp.float32)
        h = h + b1_ref[...]
        h = jnp.maximum(h, 0.0)                               # ReLU
        hb = h.astype(jnp.bfloat16)
        # Reassociation: layer-2 aggregation runs on the pre-projected operand,
        #   A @ (h @ Wn2)  ==  (A @ h) @ Wn2
        p2_ref[pl.ds(row, tm), :] = jnp.dot(
            hb, wn2_ref[...], preferred_element_type=jnp.float32).astype(jnp.bfloat16)
        # Layer-2 self term + bias, precomputed once per panel, kept in f32.
        s2_ref[pl.ds(row, tm), :] = (
            jnp.dot(hb, ws2_ref[...], preferred_element_type=jnp.float32) + b2_ref[...])

    @pl.when((layer == 1) & (k == nk - 1))
    def _():
        row = pl.multiple_of(m * tm, tm)
        out_ref[0, :, :] = (acc_ref[:, :o_pad]
                            + s2_ref[pl.ds(row, tm), :]).astype(out_ref.dtype)


def graphsage_forward(adj_mean, in_feat, params, *, block_nodes=256):
    """Fused two-layer GraphSAGE forward (conv1 -> ReLU -> conv2), one pallas_call."""
    ws1, wn1, b1, ws2, wn2, b2 = params
    n = in_feat.shape[0]
    in_dim, h_dim = ws1.shape
    o_dim = ws2.shape[1]

    # Lane-dense padding: feature dims -> multiples of 128; nodes -> multiple of tile.
    in_pad = _round_up(in_dim, 128)
    h_pad = _round_up(h_dim, 128)
    o_pad = _round_up(o_dim, 128)
    tile = min(block_nodes, _round_up(n, 128))
    n_pad = _round_up(n, tile)
    tm = tk = tile
    acc_w = max(in_pad, o_pad)

    bf16 = jnp.bfloat16
    adj_p = jnp.zeros((n_pad, n_pad), bf16).at[:n, :n].set(adj_mean.astype(bf16))
    x_p = jnp.zeros((n_pad, in_pad), bf16).at[:n, :in_dim].set(in_feat.astype(bf16))
    ws1_p = jnp.zeros((in_pad, h_pad), bf16).at[:in_dim, :h_dim].set(ws1.astype(bf16))
    wn1_p = jnp.zeros((in_pad, h_pad), bf16).at[:in_dim, :h_dim].set(wn1.astype(bf16))
    b1_p = jnp.zeros((1, h_pad), jnp.float32).at[0, :h_dim].set(b1)
    ws2_p = jnp.zeros((h_pad, o_pad), bf16).at[:h_dim, :o_dim].set(ws2.astype(bf16))
    wn2_p = jnp.zeros((h_pad, o_pad), bf16).at[:h_dim, :o_dim].set(wn2.astype(bf16))
    b2_p = jnp.zeros((1, o_pad), jnp.float32).at[0, :o_dim].set(b2)

    grid = (2, n_pad // tm, n_pad // tk)
    kernel = functools.partial(_fused_sage_kernel, tm=tm, tk=tk,
                               in_pad=in_pad, o_pad=o_pad)

    # Output carries a leading layer-phase axis so no output block is ever
    # revisited: phase-0 flushes land in the discardable out[0] slab, phase 1
    # writes the real result into out[1].
    out_p = pl.pallas_call(
        kernel,
        out_shape=jax.ShapeDtypeStruct((2, n_pad, o_pad), jnp.float32),
        grid=grid,
        in_specs=[
            pl.BlockSpec((tm, tk), lambda l, m, k: (m, k)),          # adjacency panel
            pl.BlockSpec((n_pad, in_pad), lambda l, m, k: (0, 0)),   # x, VMEM-resident
            pl.BlockSpec((in_pad, h_pad), lambda l, m, k: (0, 0)),   # W_self1
            pl.BlockSpec((in_pad, h_pad), lambda l, m, k: (0, 0)),   # W_neigh1
            pl.BlockSpec((1, h_pad), lambda l, m, k: (0, 0)),        # b1
            pl.BlockSpec((h_pad, o_pad), lambda l, m, k: (0, 0)),    # W_self2
            pl.BlockSpec((h_pad, o_pad), lambda l, m, k: (0, 0)),    # W_neigh2
            pl.BlockSpec((1, o_pad), lambda l, m, k: (0, 0)),        # b2
        ],
        out_specs=pl.BlockSpec((1, tm, o_pad), lambda l, m, k: (l, m, 0)),
        scratch_shapes=[
            pltpu.VMEM((tm, acc_w), jnp.float32),       # aggregation accumulator
            pltpu.VMEM((n_pad, o_pad), jnp.bfloat16),   # p2 = ReLU(h1) @ W_neigh2
            pltpu.VMEM((n_pad, o_pad), jnp.float32),    # s2 = ReLU(h1) @ W_self2 + b2
        ],
        compiler_params=pltpu.CompilerParams(
            dimension_semantics=("arbitrary", "arbitrary", "arbitrary"),
            vmem_limit_bytes=32 * 1024 * 1024,   # fits v7x's 64 MiB with headroom
        ),
    )(adj_p, x_p, ws1_p, wn1_p, b1_p, ws2_p, wn2_p, b2_p)

    return out_p[1, :n, :o_dim]


def build_graph(n_nodes):
    """Deterministic undirected ring graph, mean-normalized (D^-1 A), no self-loops."""
    idx = jnp.arange(n_nodes)
    a = jnp.zeros((n_nodes, n_nodes), jnp.float32)
    a = a.at[idx, (idx + 1) % n_nodes].set(1.0)
    a = a.at[(idx + 1) % n_nodes, idx].set(1.0)
    deg = jnp.maximum(a.sum(axis=1), 1.0)
    return a / deg[:, None]


def init_params(key, in_dim, hid_dim, out_dim):
    """Glorot-uniform W_self/W_neigh per layer + small random biases."""
    ks = jax.random.split(key, 6)

    def glorot(k, fan_in, fan_out):
        lim = jnp.sqrt(6.0 / (fan_in + fan_out))
        return jax.random.uniform(k, (fan_in, fan_out), jnp.float32, -lim, lim)

    ws1 = glorot(ks[0], in_dim, hid_dim)
    wn1 = glorot(ks[1], in_dim, hid_dim)
    b1 = 0.1 * jax.random.normal(ks[2], (hid_dim,), jnp.float32)
    ws2 = glorot(ks[3], hid_dim, out_dim)
    wn2 = glorot(ks[4], hid_dim, out_dim)
    b2 = 0.1 * jax.random.normal(ks[5], (out_dim,), jnp.float32)
    return (ws1, wn1, b1, ws2, wn2, b2)


if __name__ == "__main__":
    N_NODES = 64
    IN_DIM = 32
    HID_DIM = 32
    OUT_DIM = 16

    key = jax.random.PRNGKey(0)
    k_feat, k_param = jax.random.split(key)

    adj_mean = build_graph(N_NODES)
    in_feat = jax.random.normal(k_feat, (N_NODES, IN_DIM), jnp.float32)
    params = init_params(k_param, IN_DIM, HID_DIM, OUT_DIM)

    out = jax.jit(graphsage_forward)(adj_mean, in_feat, params)
    out = jax.block_until_ready(out)

    # Plain-JAX f32 reference of the same GraphSAGE forward.
    ws1, wn1, b1, ws2, wn2, b2 = params
    h = in_feat @ ws1 + (adj_mean @ in_feat) @ wn1 + b1
    h = jnp.maximum(h, 0.0)
    ref = h @ ws2 + (adj_mean @ h) @ wn2 + b2

    assert out.shape == (N_NODES, OUT_DIM)
    # bf16 MXU inputs with f32 accumulation -> loosened tolerance vs f32 reference.
    assert jnp.allclose(out, ref, atol=5e-2, rtol=5e-2)

    print("KERNEL_OK")
</pallas_src>

<mosaic_0001>
module attributes {stable_mosaic.version = 11 : i64} {
  func.func @_fused_sage_kernel(%arg0: i32, %arg1: i32, %arg2: i32, %arg3: memref<128x128xbf16, #tpu.memory_space<vmem>>, %arg4: memref<128x128xbf16, #tpu.memory_space<vmem>>, %arg5: memref<128x128xbf16, #tpu.memory_space<vmem>>, %arg6: memref<128x128xbf16, #tpu.memory_space<vmem>>, %arg7: memref<1x128xf32, #tpu.memory_space<vmem>>, %arg8: memref<128x128xbf16, #tpu.memory_space<vmem>>, %arg9: memref<128x128xbf16, #tpu.memory_space<vmem>>, %arg10: memref<1x128xf32, #tpu.memory_space<vmem>>, %arg11: memref<1x128x128xf32, #tpu.memory_space<vmem>>, %arg12: memref<128x128xf32, #tpu.memory_space<vmem>>, %arg13: memref<128x128xbf16, #tpu.memory_space<vmem>>, %arg14: memref<128x128xf32, #tpu.memory_space<vmem>>) attributes {dimension_semantics = [#tpu.dimension_semantics<arbitrary>, #tpu.dimension_semantics<arbitrary>, #tpu.dimension_semantics<arbitrary>], iteration_bounds = array<i64: 2, 1, 1>, scalar_prefetch = 0 : i64, scratch_operands = 3 : i64, tpu.core_type = #tpu.core_type<tc>, window_params = [{transform_indices = @transform_0, window_bounds = array<i64: 128, 128>}, {pipeline_mode = #tpu.pipeline_mode<synchronous>, transform_indices = @transform_1, window_bounds = array<i64: 128, 128>}, {pipeline_mode = #tpu.pipeline_mode<synchronous>, transform_indices = @transform_2, window_bounds = array<i64: 128, 128>}, {pipeline_mode = #tpu.pipeline_mode<synchronous>, transform_indices = @transform_3, window_bounds = array<i64: 128, 128>}, {pipeline_mode = #tpu.pipeline_mode<synchronous>, transform_indices = @transform_4, window_bounds = array<i64: 1, 128>}, {pipeline_mode = #tpu.pipeline_mode<synchronous>, transform_indices = @transform_5, window_bounds = array<i64: 128, 128>}, {pipeline_mode = #tpu.pipeline_mode<synchronous>, transform_indices = @transform_6, window_bounds = array<i64: 128, 128>}, {pipeline_mode = #tpu.pipeline_mode<synchronous>, transform_indices = @transform_7, window_bounds = array<i64: 1, 128>}, {transform_indices = @transform_8, window_bounds = array<i64: 1, 128, 128>}]} {
    %c0_i32 = arith.constant 0 : i32
    %0 = arith.cmpi eq, %arg2, %c0_i32 : i32
    %1 = arith.extui %0 : i1 to i32
    %c0_i32_0 = arith.constant 0 : i32
    %2 = arith.cmpi ne, %1, %c0_i32_0 : i32
    scf.if %2 {
      %cst = arith.constant 0.000000e+00 : f32
      %20 = vector.broadcast %cst : f32 to vector<128x128xf32>
      %c0_11 = arith.constant 0 : index
      %c0_12 = arith.constant 0 : index
      %21 = vector.load %arg12[%c0_11, %c0_12] : memref<128x128xf32, #tpu.memory_space<vmem>>, vector<128x128xf32>
      tpu.vector_store %arg12[%c0_11, %c0_12], %20 {strides = array<i32>} : memref<128x128xf32, #tpu.memory_space<vmem>>, vector<128x128xf32>,
    } else {
    }
    %c0 = arith.constant 0 : index
    %c0_1 = arith.constant 0 : index
    %3 = vector.load %arg3[%c0, %c0_1] : memref<128x128xbf16, #tpu.memory_space<vmem>>, vector<128x128xbf16>
    %c0_i32_2 = arith.constant 0 : i32
    %4 = arith.cmpi eq, %arg0, %c0_i32_2 : i32
    %5 = arith.extui %4 : i1 to i32
    %c0_i32_3 = arith.constant 0 : i32
    %6 = arith.cmpi ne, %5, %c0_i32_3 : i32
    scf.if %6 {
      %c128_i32 = arith.constant 128 : i32
      %20 = arith.muli %arg2, %c128_i32 : i32
      %21 = tpu.assume_multiple %20, 128 : i32
      %22 = arith.index_cast %21 : i32 to index
      %c0_11 = arith.constant 0 : index
      %23 = vector.load %arg4[%22, %c0_11] : memref<128x128xbf16, #tpu.memory_space<vmem>>, vector<128x128xbf16>
      %c0_12 = arith.constant 0 : index
      %c0_13 = arith.constant 0 : index
      %24 = vector.load %arg12[%c0_12, %c0_13] : memref<128x128xf32, #tpu.memory_space<vmem>>, vector<128x128xf32>
      %cst = arith.constant dense<0.000000e+00> : vector<128x128xf32>
      %25 = tpu.matmul %3, %23, %cst {dimension_numbers = #tpu.dot_dimension_numbers<[1], [0], [0], [1], [0, 0, 1, 1], [], []>} : vector<128x128xbf16>, vector<128x128xbf16>, vector<128x128xf32> -> vector<128x128xf32>
      %26 = arith.addf %24, %25 : vector<128x128xf32>
      %c0_14 = arith.constant 0 : index
      %c0_15 = arith.constant 0 : index
      %27 = vector.load %arg12[%c0_14, %c0_15] : memref<128x128xf32, #tpu.memory_space<vmem>>, vector<128x128xf32>
      tpu.vector_store %arg12[%c0_14, %c0_15], %26 {strides = array<i32>} : memref<128x128xf32, #tpu.memory_space<vmem>>, vector<128x128xf32>,
    } else {
    }
    %c1_i32 = arith.constant 1 : i32
    %7 = arith.cmpi eq, %arg0, %c1_i32 : i32
    %8 = arith.extui %7 : i1 to i32
    %c0_i32_4 = arith.constant 0 : i32
    %9 = arith.cmpi ne, %8, %c0_i32_4 : i32
    scf.if %9 {
      %c128_i32 = arith.constant 128 : i32
      %20 = arith.muli %arg2, %c128_i32 : i32
      %21 = tpu.assume_multiple %20, 128 : i32
      %22 = arith.index_cast %21 : i32 to index
      %c0_11 = arith.constant 0 : index
      %23 = vector.load %arg13[%22, %c0_11] : memref<128x128xbf16, #tpu.memory_space<vmem>>, vector<128x128xbf16>
      %c0_12 = arith.constant 0 : index
      %c0_13 = arith.constant 0 : index
      %24 = vector.load %arg12[%c0_12, %c0_13] : memref<128x128xf32, #tpu.memory_space<vmem>>, vector<128x128xf32>
      %cst = arith.constant dense<0.000000e+00> : vector<128x128xf32>
      %25 = tpu.matmul %3, %23, %cst {dimension_numbers = #tpu.dot_dimension_numbers<[1], [0], [0], [1], [0, 0, 1, 1], [], []>} : vector<128x128xbf16>, vector<128x128xbf16>, vector<128x128xf32> -> vector<128x128xf32>
      %26 = arith.addf %24, %25 : vector<128x128xf32>
      %c0_14 = arith.constant 0 : index
      %c0_15 = arith.constant 0 : index
      %27 = vector.load %arg12[%c0_14, %c0_15] : memref<128x128xf32, #tpu.memory_space<vmem>>, vector<128x128xf32>
      tpu.vector_store %arg12[%c0_14, %c0_15], %26 {strides = array<i32>} : memref<128x128xf32, #tpu.memory_space<vmem>>, vector<128x128xf32>,
    } else {
    }
    %c0_i32_5 = arith.constant 0 : i32
    %10 = arith.cmpi eq, %arg0, %c0_i32_5 : i32
    %c0_i32_6 = arith.constant 0 : i32
    %11 = arith.cmpi eq, %arg2, %c0_i32_6 : i32
    %12 = arith.andi %10, %11 : i1
    %13 = arith.extui %12 : i1 to i32
    %c0_i32_7 = arith.constant 0 : i32
    %14 = arith.cmpi ne, %13, %c0_i32_7 : i32
    scf.if %14 {
      %c128_i32 = arith.constant 128 : i32
      %20 = arith.muli %arg1, %c128_i32 : i32
      %21 = tpu.assume_multiple %20, 128 : i32
      %22 = arith.index_cast %21 : i32 to index
      %c0_11 = arith.constant 0 : index
      %23 = vector.load %arg4[%22, %c0_11] : memref<128x128xbf16, #tpu.memory_space<vmem>>, vector<128x128xbf16>
      %c0_12 = arith.constant 0 : index
      %c0_13 = arith.constant 0 : index
      %24 = vector.load %arg12[%c0_12, %c0_13] : memref<128x128xf32, #tpu.memory_space<vmem>>, vector<128x128xf32>
      %25 = arith.truncf %24 : vector<128x128xf32> to vector<128x128xbf16>
      %c0_14 = arith.constant 0 : index
      %c0_15 = arith.constant 0 : index
      %26 = vector.load %arg5[%c0_14, %c0_15] : memref<128x128xbf16, #tpu.memory_space<vmem>>, vector<128x128xbf16>
      %cst = arith.constant dense<0.000000e+00> : vector<128x128xf32>
      %27 = tpu.matmul %23, %26, %cst {dimension_numbers = #tpu.dot_dimension_numbers<[1], [0], [0], [1], [0, 0, 1, 1], [], []>} : vector<128x128xbf16>, vector<128x128xbf16>, vector<128x128xf32> -> vector<128x128xf32>
      %c0_16 = arith.constant 0 : index
      %c0_17 = arith.constant 0 : index
      %28 = vector.load %arg6[%c0_16, %c0_17] : memref<128x128xbf16, #tpu.memory_space<vmem>>, vector<128x128xbf16>
      %cst_18 = arith.constant dense<0.000000e+00> : vector<128x128xf32>
      %29 = tpu.matmul %25, %28, %cst_18 {dimension_numbers = #tpu.dot_dimension_numbers<[1], [0], [0], [1], [0, 0, 1, 1], [], []>} : vector<128x128xbf16>, vector<128x128xbf16>, vector<128x128xf32> -> vector<128x128xf32>
      %30 = arith.addf %27, %29 : vector<128x128xf32>
      %c0_19 = arith.constant 0 : index
      %c0_20 = arith.constant 0 : index
      %31 = vector.load %arg7[%c0_19, %c0_20] : memref<1x128xf32, #tpu.memory_space<vmem>>, vector<1x128xf32>
      %32 = vector.broadcast %31 : vector<1x128xf32> to vector<128x128xf32>
      %33 = arith.addf %30, %32 : vector<128x128xf32>
      %cst_21 = arith.constant 0.000000e+00 : f32
      %34 = vector.broadcast %cst_21 : f32 to vector<128x128xf32>
      %35 = arith.maximumf %33, %34 : vector<128x128xf32>
      %36 = arith.truncf %35 : vector<128x128xf32> to vector<128x128xbf16>
      %c0_22 = arith.constant 0 : index
      %c0_23 = arith.constant 0 : index
      %37 = vector.load %arg9[%c0_22, %c0_23] : memref<128x128xbf16, #tpu.memory_space<vmem>>, vector<128x128xbf16>
      %cst_24 = arith.constant dense<0.000000e+00> : vector<128x128xf32>
      %38 = tpu.matmul %36, %37, %cst_24 {dimension_numbers = #tpu.dot_dimension_numbers<[1], [0], [0], [1], [0, 0, 1, 1], [], []>} : vector<128x128xbf16>, vector<128x128xbf16>, vector<128x128xf32> -> vector<128x128xf32>
      %39 = arith.truncf %38 : vector<128x128xf32> to vector<128x128xbf16>
      %40 = arith.index_cast %21 : i32 to index
      %c0_25 = arith.constant 0 : index
      %41 = vector.load %arg13[%40, %c0_25] : memref<128x128xbf16, #tpu.memory_space<vmem>>, vector<128x128xbf16>
      tpu.vector_store %arg13[%40, %c0_25], %39 {strides = array<i32>} : memref<128x128xbf16, #tpu.memory_space<vmem>>, vector<128x128xbf16>,
      %c0_26 = arith.constant 0 : index
      %c0_27 = arith.constant 0 : index
      %42 = vector.load %arg8[%c0_26, %c0_27] : memref<128x128xbf16, #tpu.memory_space<vmem>>, vector<128x128xbf16>
      %cst_28 = arith.constant dense<0.000000e+00> : vector<128x128xf32>
      %43 = tpu.matmul %36, %42, %cst_28 {dimension_numbers = #tpu.dot_dimension_numbers<[1], [0], [0], [1], [0, 0, 1, 1], [], []>} : vector<128x128xbf16>, vector<128x128xbf16>, vector<128x128xf32> -> vector<128x128xf32>
      %c0_29 = arith.constant 0 : index
      %c0_30 = arith.constant 0 : index
      %44 = vector.load %arg10[%c0_29, %c0_30] : memref<1x128xf32, #tpu.memory_space<vmem>>, vector<1x128xf32>
      %45 = vector.broadcast %44 : vector<1x128xf32> to vector<128x128xf32>
      %46 = arith.addf %43, %45 : vector<128x128xf32>
      %47 = arith.index_cast %21 : i32 to index
      %c0_31 = arith.constant 0 : index
      %48 = vector.load %arg14[%47, %c0_31] : memref<128x128xf32, #tpu.memory_space<vmem>>, vector<128x128xf32>
      tpu.vector_store %arg14[%47, %c0_31], %46 {strides = array<i32>} : memref<128x128xf32, #tpu.memory_space<vmem>>, vector<128x128xf32>,
    } else {
    }
    %c1_i32_8 = arith.constant 1 : i32
    %15 = arith.cmpi eq, %arg0, %c1_i32_8 : i32
    %c0_i32_9 = arith.constant 0 : i32
    %16 = arith.cmpi eq, %arg2, %c0_i32_9 : i32
    %17 = arith.andi %15, %16 : i1
    %18 = arith.extui %17 : i1 to i32
    %c0_i32_10 = arith.constant 0 : i32
    %19 = arith.cmpi ne, %18, %c0_i32_10 : i32
    scf.if %19 {
      %c128_i32 = arith.constant 128 : i32
      %20 = arith.muli %arg1, %c128_i32 : i32
      %21 = tpu.assume_multiple %20, 128 : i32
      %c0_11 = arith.constant 0 : index
      %c0_12 = arith.constant 0 : index
      %22 = vector.load %arg12[%c0_11, %c0_12] : memref<128x128xf32, #tpu.memory_space<vmem>>, vector<128x128xf32>
      %23 = arith.index_cast %21 : i32 to index
      %c0_13 = arith.constant 0 : index
      %24 = vector.load %arg14[%23, %c0_13] : memref<128x128xf32, #tpu.memory_space<vmem>>, vector<128x128xf32>
      %25 = arith.addf %22, %24 : vector<128x128xf32>
      %c0_14 = arith.constant 0 : index
      %c0_15 = arith.constant 0 : index
      %c0_16 = arith.constant 0 : index
      %26 = vector.load %arg11[%c0_14, %c0_15, %c0_16] : memref<1x128x128xf32, #tpu.memory_space<vmem>>, vector<1x128x128xf32>
      %27 = vector.shape_cast %26 : vector<1x128x128xf32> to vector<128x128xf32>
      %28 = vector.shape_cast %25 : vector<128x128xf32> to vector<1x128x128xf32>
      tpu.vector_store %arg11[%c0_14, %c0_15, %c0_16], %28 {strides = array<i32>} : memref<1x128x128xf32, #tpu.memory_space<vmem>>, vector<1x128x128xf32>,
    } else {
    }
    return
  }
  func.func @transform_0(%arg0: i32, %arg1: i32, %arg2: i32) -> (i32, i32) {
    %c0_i32 = arith.constant 0 : i32
    return %arg1, %arg2 : i32, i32
  }
  func.func @transform_1(%arg0: i32, %arg1: i32, %arg2: i32) -> (i32, i32) {
    %c0_i32 = arith.constant 0 : i32
    %c0_i32_0 = arith.constant 0 : i32
    %c0_i32_1 = arith.constant 0 : i32
    return %c0_i32, %c0_i32_0 : i32, i32
  }
  func.func @transform_2(%arg0: i32, %arg1: i32, %arg2: i32) -> (i32, i32) {
    %c0_i32 = arith.constant 0 : i32
    %c0_i32_0 = arith.constant 0 : i32
    %c0_i32_1 = arith.constant 0 : i32
    return %c0_i32, %c0_i32_0 : i32, i32
  }
  func.func @transform_3(%arg0: i32, %arg1: i32, %arg2: i32) -> (i32, i32) {
    %c0_i32 = arith.constant 0 : i32
    %c0_i32_0 = arith.constant 0 : i32
    %c0_i32_1 = arith.constant 0 : i32
    return %c0_i32, %c0_i32_0 : i32, i32
  }
  func.func @transform_4(%arg0: i32, %arg1: i32, %arg2: i32) -> (i32, i32) {
    %c0_i32 = arith.constant 0 : i32
    %c0_i32_0 = arith.constant 0 : i32
    %c0_i32_1 = arith.constant 0 : i32
    return %c0_i32, %c0_i32_0 : i32, i32
  }
  func.func @transform_5(%arg0: i32, %arg1: i32, %arg2: i32) -> (i32, i32) {
    %c0_i32 = arith.constant 0 : i32
    %c0_i32_0 = arith.constant 0 : i32
    %c0_i32_1 = arith.constant 0 : i32
    return %c0_i32, %c0_i32_0 : i32, i32
  }
  func.func @transform_6(%arg0: i32, %arg1: i32, %arg2: i32) -> (i32, i32) {
    %c0_i32 = arith.constant 0 : i32
    %c0_i32_0 = arith.constant 0 : i32
    %c0_i32_1 = arith.constant 0 : i32
    return %c0_i32, %c0_i32_0 : i32, i32
  }
  func.func @transform_7(%arg0: i32, %arg1: i32, %arg2: i32) -> (i32, i32) {
    %c0_i32 = arith.constant 0 : i32
    %c0_i32_0 = arith.constant 0 : i32
    %c0_i32_1 = arith.constant 0 : i32
    return %c0_i32, %c0_i32_0 : i32, i32
  }
  func.func @transform_8(%arg0: i32, %arg1: i32, %arg2: i32) -> (i32, i32, i32) {
    %c0_i32 = arith.constant 0 : i32
    %c0_i32_0 = arith.constant 0 : i32
    return %arg0, %arg1, %c0_i32 : i32, i32, i32
  }
}

</mosaic_0001>

<bundles_post_ra>
// kernel: graphsage_forward.1
= control target key start
LH: loop header
LB: loop body
LE: loop exit
PB: predicated region body
PF: predicated region fallthrough
CT: control target
= control target key end

     0   :  { %s2427_s27 = smov 0   ;;  %s2429_s28 = smov 0   ;;  %s2777_s0 = inlined_call_operand.vmem [shape: bf16[128,128], index: 0, kind: input, shape index: {}]   ;;  %s2778_s1 = inlined_call_operand.vmem [shape: bf16[128,128], index: 1, kind: input, shape index: {}]   ;;  %s2779_s2 = inlined_call_operand.vmem [shape: bf16[128,128], index: 2, kind: input, shape index: {}]   ;;  %s2780_s3 = inlined_call_operand.vmem [shape: bf16[128,128], index: 3, kind: input, shape index: {}]   ;;  %s2781_s4 = inlined_call_operand.vmem [shape: f32[1,128], index: 4, kind: input, shape index: {}]   ;;  %s2782_s5 = inlined_call_operand.vmem [shape: bf16[128,128], index: 5, kind: input, shape index: {}]   ;;  %s2783_s6 = inlined_call_operand.vmem [shape: bf16[128,128], index: 6, kind: input, shape index: {}]   ;;  %s2784_s7 = inlined_call_operand.vmem [shape: f32[1,128], index: 7, kind: input, shape index: {}]   ;;  %s2785_s8 = inlined_call_operand.vmem [shape: f32[2,128,128], index: 8, kind: output, shape index: {}]  }
   0x1   :  { %s2431_s29 = smov 0  }
   0x2 LB: > { %s37_s30 = sadd.s32 1, %s2375_s28  ;;  %p1870_p0 = scmp.ge.s32.totalorder %s2379_s29, 1  ;;  %s2379_s29 = sphi %s2431_s29, %s18_s29   ;;  %s2375_s28 = sphi %s2429_s28, %s2787_s28   ;;  %s2371_s27 = sphi %s2427_s27, %s2786_s27  }
   0x3   : > { %p39_p1 = scmp.ge.s32.totalorder %s37_s30, 2  ;;  %p289_p2 = scmp.lt.s32.totalorder %s2379_s29, 3 }
   0x5   : > { %s2789_s30 = smov (%p39_p1, %s37_s30), 0  ;;  %p290_p3 = pnand %p1870_p0, %p289_p2 }
   0x6   : > { %p340_p4 = scmp.lt.s32.totalorder (!%p290_p3), %s2371_s27, 1  ;;  %v2451_v0 = vld [vmem:[%s2777_s0] sm:$0xf] (!%p290_p3)  ;;  %v2456_v1 = vld [vmem:[%s2777_s0 + $0x4] sm:$0xf] (!%p290_p3)  ;;  %v2381_v2 = vmov (!%p290_p3), 0.0  }
   0x7   : > { %293 = sbr.rel (%p290_p3) target bundleno = 1112 (0x458), region = 52  ;;  %354 = vst [vmem:[#allocation2] sm:$0xff] (!%p290_p3), %v2381_v2  ;;  %355 = vst [vmem:[#allocation2 + $0x8] sm:$0xff] (!%p290_p3), %v2381_v2  ;;  %v2461_v3 = vld [vmem:[%s2777_s0 + $0x8] sm:$0xf] (!%p290_p3)  ;;  %p386_p5 = scmp.eq.s32.totalorder (!%p290_p3), %s2371_s27, 0 }
   0x8   : > { %356 = vst [vmem:[#allocation2 + $0x10] sm:$0xff] (!%p290_p3), %v2381_v2  ;;  %357 = vst [vmem:[#allocation2 + $0x18] sm:$0xff] (!%p290_p3), %v2381_v2  ;;  %v2466_v4 = vld [vmem:[%s2777_s0 + $0xc] sm:$0xf] (!%p290_p3)  ;;  %v2471_v5 = vld [vmem:[%s2777_s0 + $0x10] sm:$0xf] (!%p290_p3) }
   0x9   : > { %358 = vst [vmem:[#allocation2 + $0x20] sm:$0xff] (!%p290_p3), %v2381_v2  ;;  %359 = vst [vmem:[#allocation2 + $0x28] sm:$0xff] (!%p290_p3), %v2381_v2  ;;  %v2479_v6 = vld [vmem:[%s2777_s0 + $0x14] sm:$0xf] (!%p290_p3)  ;;  %v2484_v7 = vld [vmem:[%s2777_s0 + $0x18] sm:$0xf] (!%p290_p3) }
   0xa   : > { %360 = vst [vmem:[#allocation2 + $0x30] sm:$0xff] (!%p290_p3), %v2381_v2  ;;  %361 = vst [vmem:[#allocation2 + $0x38] sm:$0xff] (!%p290_p3), %v2381_v2  ;;  %v2489_v8 = vld [vmem:[%s2777_s0 + $0x1c] sm:$0xf] (!%p290_p3)  ;;  %v2494_v9 = vld [vmem:[%s2777_s0 + $0x20] sm:$0xf] (!%p290_p3) }
   0xb   : > { %362 = vst [vmem:[#allocation2 + $0x40] sm:$0xff] (!%p290_p3), %v2381_v2  ;;  %363 = vst [vmem:[#allocation2 + $0x48] sm:$0xff] (!%p290_p3), %v2381_v2  ;;  %v2499_v10 = vld [vmem:[%s2777_s0 + $0x24] sm:$0xf] (!%p290_p3)  ;;  %v2504_v11 = vld [vmem:[%s2777_s0 + $0x28] sm:$0xf] (!%p290_p3) }
   0xc   : > { %364 = vst [vmem:[#allocation2 + $0x50] sm:$0xff] (!%p290_p3), %v2381_v2  ;;  %365 = vst [vmem:[#allocation2 + $0x58] sm:$0xff] (!%p290_p3), %v2381_v2  ;;  %v2509_v12 = vld [vmem:[%s2777_s0 + $0x2c] sm:$0xf] (!%p290_p3)  ;;  %v2520_v13 = vld [vmem:[%s2777_s0 + $0x30] sm:$0xf] (!%p290_p3) }
   0xd   : > { %366 = vst [vmem:[#allocation2 + $0x60] sm:$0xff] (!%p290_p3), %v2381_v2  ;;  %367 = vst [vmem:[#allocation2 + $0x68] sm:$0xff] (!%p290_p3), %v2381_v2  ;;  %v2525_v14 = vld [vmem:[%s2777_s0 + $0x34] sm:$0xf] (!%p290_p3)  ;;  %v2530_v15 = vld [vmem:[%s2777_s0 + $0x38] sm:$0xf] (!%p290_p3) }
   0xe   : > { %368 = vst [vmem:[#allocation2 + $0x70] sm:$0xff] %v2381_v2  ;;  %369 = vst [vmem:[#allocation2 + $0x78] sm:$0xff] %v2381_v2  ;;  %s341_s19 = scalar_select %p340_p4, %s2371_s27, 1  ;;  %v2535_v16 = vld [vmem:[%s2777_s0 + $0x3c] sm:$0xf] }
   0xf   : > { %p1873_p6 = scmp.ne.s32.totalorder %s2371_s27, 0 }
  0x10   : > { %s1945_s12 = sshll.u32 %s341_s19, 7  ;;  %v2309_v17 = vld [vmem:[%s2778_s1] sm:$0xff] (!%p1873_p6)   ;;  %v2310_v18 = vld [vmem:[%s2778_s1 + $0x8] sm:$0xff] (!%p1873_p6)   ;;  %v1874_v19 = vcombine.low (!%p1873_p6), %v2451_v0, %v2456_v1  ;;  %v1878_v20 = vcombine.low (!%p1873_p6), %v2494_v9, %v2499_v10  ;;  %v2311_v21 = vld [vmem:[%s2778_s1 + $0x10] sm:$0xff] (!%p1873_p6)   ;;  %v1875_v27 = vcombine.low (!%p1873_p6), %v2461_v3, %v2466_v4  ;;  %v1879_v28 = vcombine.low (!%p1873_p6), %v2504_v11, %v2509_v12 }
  0x11   : > { %s2515_s20 = scalar_lea.vmem %s2785_s8, %s1945_s12  ;;  %389 = sbr.rel (%p1873_p6) target bundleno = 275 (0x113), region = 60  ;;  %2044 = vmatprep.subr.bf16.mxu0 (!%p1873_p6), %v2309_v17  ;;  %2236 = vmatprep.subr.bf16.mxu1 (!%p1873_p6), %v2309_v17  ;;  %v2312_v22 = vld [vmem:[%s2778_s1 + $0x18] sm:$0xff] (!%p1873_p6)   ;;  %v2313_v23 = vld [vmem:[%s2778_s1 + $0x20] sm:$0xff] (!%p1873_p6)   ;;  %v2314_v24 = vld [vmem:[%s2778_s1 + $0x28] sm:$0xff] (!%p1873_p6)   ;;  %v1876_v29 = vcombine.low (!%p1873_p6), %v2471_v5, %v2479_v6  ;;  %v1880_v30 = vcombine.low (!%p1873_p6), %v2520_v13, %v2525_v14  ;;  %v1877_v31 = vcombine.low (!%p1873_p6), %v2484_v7, %v2489_v8 }
  0x12   : > { %2045 = vmatpush3.bf16.msra.mxu0 (!%p1873_p6), %v2309_v17  ;;  %2244 = vmatpush3.bf16.msra.mxu1 (!%p1873_p6), %v2309_v17  ;;  %v2315_v25 = vld [vmem:[%s2778_s1 + $0x30] sm:$0xff] (!%p1873_p6)   ;;  %v2316_v26 = vld [vmem:[%s2778_s1 + $0x38] sm:$0xff] (!%p1873_p6)   ;;  %v1881_v32 = vcombine.low (!%p1873_p6), %v2530_v15, %v2535_v16  ;;  %v411_v35 = vld [vmem:[#allocation2] sm:$0xff] (!%p1873_p6) }
  0x13   : > { %2046 = vmatprep.subr.bf16.mxu0 (!%p1873_p6), %v2310_v18  ;;  %2237 = vmatprep.subr.bf16.mxu1 (!%p1873_p6), %v2310_v18  ;;  %v413_v33 = vld [vmem:[#allocation2 + $0x10] sm:$0xff] (!%p1873_p6)  ;;  %v419_v36 = vld [vmem:[#allocation2 + $0x40] sm:$0xff] (!%p1873_p6)  ;;  %v414_v39 = vld [vmem:[#allocation2 + $0x18] sm:$0xff] (!%p1873_p6) }
  0x14   : > { %2060 = vmatprep.mubr.bf16.mxu0 (!%p1873_p6), %v1874_v19  ;;  %2068 = vmatprep.mubr.bf16.mxu1 (!%p1873_p6), %v1878_v20  ;;  %v421_v34 = vld [vmem:[#allocation2 + $0x50] sm:$0xff] (!%p1873_p6)  ;;  %v422_v40 = vld [vmem:[#allocation2 + $0x58] sm:$0xff] (!%p1873_p6)  ;;  %v412_v45 = vld [vmem:[#allocation2 + $0x8] sm:$0xff] (!%p1873_p6) }
  0x15   : > { %v420_v46 = vld [vmem:[#allocation2 + $0x48] sm:$0xff] (!%p1873_p6)  ;;  %v417_v57 = vld [vmem:[#allocation2 + $0x30] sm:$0xff] (!%p1873_p6)  ;;  %v415_v59 = vld [vmem:[#allocation2 + $0x20] sm:$0xff] (!%p1873_p6) }
  0x16   : > { %2047 = vmatpush3.bf16.msra.mxu0 (!%p1873_p6), %v2310_v18  ;;  %2245 = vmatpush3.bf16.msra.mxu1 (!%p1873_p6), %v2310_v18  ;;  %v425_v58 = vld [vmem:[#allocation2 + $0x70] sm:$0xff] (!%p1873_p6)  ;;  %v423_v60 = vld [vmem:[#allocation2 + $0x60] sm:$0xff] (!%p1873_p6)  ;;  %v418_v63 = vld [vmem:[#allocation2 + $0x38] sm:$0xff] (!%p1873_p6) }
  0x17   : > { %2048 = vmatprep.subr.bf16.mxu0 (!%p1873_p6), %v2311_v21  ;;  %2238 = vmatprep.subr.bf16.mxu1 (!%p1873_p6), %v2311_v21  ;;  %v426_v2 = vld [vmem:[#allocation2 + $0x78] sm:$0xff] (!%p1873_p6) }
  0x1a   : > { %2049 = vmatpush3.bf16.msra.mxu0 %v2311_v21  ;;  %2246 = vmatpush3.bf16.msra.mxu1 %v2311_v21  ;;  %v416_v21 = vld [vmem:[#allocation2 + $0x28] sm:$0xff] }
  0x1b   : > { %2050 = vmatprep.subr.bf16.mxu0 %v2312_v22  ;;  %2239 = vmatprep.subr.bf16.mxu1 %v2312_v22 }
  0x1e   : > { %2051 = vmatpush3.bf16.msra.mxu0 %v2312_v22  ;;  %2247 = vmatpush3.bf16.msra.mxu1 %v2312_v22  ;;  %v424_v22 = vld [vmem:[#allocation2 + $0x68] sm:$0xff] }
  0x1f   : > { %2052 = vmatprep.subr.bf16.mxu0 %v2313_v23  ;;  %2240 = vmatprep.subr.bf16.mxu1 %v2313_v23 }
  0x22   : > { %2053 = vmatpush3.bf16.msra.mxu0 %v2313_v23  ;;  %2248 = vmatpush3.bf16.msra.mxu1 %v2313_v23 }
  0x23   : > { %2054 = vmatprep.subr.bf16.mxu0 %v2314_v24  ;;  %2241 = vmatprep.subr.bf16.mxu1 %v2314_v24 }
  0x26   : > { %2055 = vmatpush3.bf16.msra.mxu0 %v2314_v24  ;;  %2249 = vmatpush3.bf16.msra.mxu1 %v2314_v24 }
  0x27   : > { %2056 = vmatprep.subr.bf16.mxu0 %v2315_v25  ;;  %2242 = vmatprep.subr.bf16.mxu1 %v2315_v25 }
  0x2a   : > { %2057 = vmatpush3.bf16.msra.mxu0 %v2315_v25  ;;  %2250 = vmatpush3.bf16.msra.mxu1 %v2315_v25 }
  0x2b   : > { %2058 = vmatprep.subr.bf16.mxu0 %v2316_v26  ;;  %2243 = vmatprep.subr.bf16.mxu1 %v2316_v26 }
  0x2e   : > { %2059 = vmatpush3.bf16.msra.mxu0 %v2316_v26  ;;  %2251 = vmatpush3.bf16.msra.mxu1 %v2316_v26 }
  0x31   : > { %2061 = vmatmul.mubr.bf16.vlgmr.msra.gmra.mrb[0].mxu0 %v1875_v27  ;;  %2069 = vmatmul.mubr.bf16.vlgmr.msra.gmra.mrb[0].mxu1 %v1879_v28 }
  0x32   : > { %2064 = vmatprep.mubr.bf16.mxu0 %v1876_v29  ;;  %2072 = vmatprep.mubr.bf16.mxu1 %v1880_v30 }
  0x39   : > { %2065 = vmatmul.mubr.bf16.gmra.mrb[4].mxu0 %v1877_v31  ;;  %2073 = vmatmul.mubr.bf16.gmra.mrb[4].mxu1 %v1881_v32 }
 0x104   : > { %v2062_v37 = vpop.f32.mrb[0].mxu0  ;;  %v2070_v38 = vpop.f32.mrb[0].mxu1 }
 0x105   : > { %v622_v41 = vadd.f32 %v2062_v37, %v413_v33  ;;  %v630_v42 = vadd.f32 %v2070_v38, %v421_v34  ;;  %v557_v43 = vpop.f32.mrb[1].mxu0  ;;  %v589_v44 = vpop.f32.mrb[1].mxu1 }
 0x106   : > { %v620_v47 = vadd.f32 %v557_v43, %v411_v35  ;;  %v628_v48 = vadd.f32 %v589_v44, %v419_v36  ;;  %v2063_v49 = vpop.f32.mrb[2].mxu0  ;;  %v2071_v50 = vpop.f32.mrb[2].mxu1 }
 0x107   : > { %638 = vst [vmem:[#allocation2 + $0x10] sm:$0xff] %v622_v41  ;;  %646 = vst [vmem:[#allocation2 + $0x50] sm:$0xff] %v630_v42  ;;  %v623_v51 = vadd.f32 %v2063_v49, %v414_v39  ;;  %v631_v52 = vadd.f32 %v2071_v50, %v422_v40  ;;  %v560_v53 = vpop.f32.mrb[3].mxu0  ;;  %v592_v54 = vpop.f32.mrb[3].mxu1 }
 0x108   : > { %636 = vst [vmem:[#allocation2] sm:$0xff] %v620_v47  ;;  %644 = vst [vmem:[#allocation2 + $0x40] sm:$0xff] %v628_v48  ;;  %v621_v55 = vadd.f32 %v560_v53, %v412_v45  ;;  %v629_v56 = vadd.f32 %v592_v54, %v420_v46 }
 0x109   : > { %639 = vst [vmem:[#allocation2 + $0x18] sm:$0xff] %v623_v51  ;;  %647 = vst [vmem:[#allocation2 + $0x58] sm:$0xff] %v631_v52 }
 0x10a   : > { %637 = vst [vmem:[#allocation2 + $0x8] sm:$0xff] %v621_v55  ;;  %645 = vst [vmem:[#allocation2 + $0x48] sm:$0xff] %v629_v56 }
 0x10c   : > { %v2066_v61 = vpop.f32.mrb[4].mxu0  ;;  %v2074_v62 = vpop.f32.mrb[4].mxu1 }
 0x10d   : > { %v626_v17 = vadd.f32 %v2066_v61, %v417_v57  ;;  %v634_v18 = vadd.f32 %v2074_v62, %v425_v58  ;;  %v573_v19 = vpop.f32.mrb[5].mxu0  ;;  %v605_v20 = vpop.f32.mrb[5].mxu1 }
 0x10e   : > { %v624_v23 = vadd.f32 %v573_v19, %v415_v59  ;;  %v632_v24 = vadd.f32 %v605_v20, %v423_v60  ;;  %v2067_v25 = vpop.f32.mrb[6].mxu0  ;;  %v2075_v26 = vpop.f32.mrb[6].mxu1 }
 0x10f   : > { %642 = vst [vmem:[#allocation2 + $0x30] sm:$0xff] %v626_v17  ;;  %650 = vst [vmem:[#allocation2 + $0x70] sm:$0xff] %v634_v18  ;;  %v627_v27 = vadd.f32 %v2067_v25, %v418_v63  ;;  %v635_v28 = vadd.f32 %v2075_v26, %v426_v2  ;;  %v576_v29 = vpop.f32.mrb[7].mxu0  ;;  %v608_v30 = vpop.f32.mrb[7].mxu1 }
 0x110   : > { %640 = vst [vmem:[#allocation2 + $0x20] sm:$0xff] %v624_v23  ;;  %648 = vst [vmem:[#allocation2 + $0x60] sm:$0xff] %v632_v24  ;;  %v625_v31 = vadd.f32 %v576_v29, %v416_v21  ;;  %v633_v32 = vadd.f32 %v608_v30, %v424_v22 }
 0x111   : > { %643 = vst [vmem:[#allocation2 + $0x38] sm:$0xff] %v627_v27  ;;  %651 = vst [vmem:[#allocation2 + $0x78] sm:$0xff] %v635_v28 }
 0x112   : > { %641 = vst [vmem:[#allocation2 + $0x28] sm:$0xff] %v625_v31  ;;  %649 = vst [vmem:[#allocation2 + $0x68] sm:$0xff] %v633_v32 }
 0x113 PF: > { %p652_p7 = scmp.eq.s32.totalorder %s2371_s27, 1  ;;  %p1890_p8 = scmp.ne.s32.totalorder %s2371_s27, 1 }
 0x114   : > { %v661_v33 = vld [vmem:[#allocation3] sm:$0xff] (!%p1890_p8)  ;;  %v662_v34 = vld [vmem:[#allocation3 + $0x8] sm:$0xff] (!%p1890_p8)  ;;  %v1891_v35 = vcombine.low (!%p1890_p8), %v2451_v0, %v2456_v1  ;;  %v1895_v36 = vcombine.low (!%p1890_p8), %v2494_v9, %v2499_v10  ;;  %v663_v37 = vld [vmem:[#allocation3 + $0x10] sm:$0xff] (!%p1890_p8)  ;;  %v1892_v39 = vcombine.low (!%p1890_p8), %v2461_v3, %v2466_v4  ;;  %v1896_v40 = vcombine.low (!%p1890_p8), %v2504_v11, %v2509_v12 }
 0x115   : > { %655 = sbr.rel (%p1890_p8) target bundleno = 535 (0x217), region = 64  ;;  %2076 = vmatprep.subr.bf16.mxu0 (!%p1890_p8), %v661_v33  ;;  %2252 = vmatprep.subr.bf16.mxu1 (!%p1890_p8), %v661_v33  ;;  %v664_v38 = vld [vmem:[#allocation3 + $0x18] sm:$0xff] (!%p1890_p8)  ;;  %v665_v0 = vld [vmem:[#allocation3 + $0x20] sm:$0xff] (!%p1890_p8)  ;;  %v666_v1 = vld [vmem:[#allocation3 + $0x28] sm:$0xff] (!%p1890_p8)  ;;  %v1893_v41 = vcombine.low (!%p1890_p8), %v2471_v5, %v2479_v6  ;;  %v1897_v42 = vcombine.low (!%p1890_p8), %v2520_v13, %v2525_v14  ;;  %v1894_v43 = vcombine.low (!%p1890_p8), %v2484_v7, %v2489_v8 }
 0x116   : > { %2077 = vmatpush3.bf16.msra.mxu0 (!%p1890_p8), %v661_v33  ;;  %2260 = vmatpush3.bf16.msra.mxu1 (!%p1890_p8), %v661_v33  ;;  %v667_v9 = vld [vmem:[#allocation3 + $0x30] sm:$0xff] (!%p1890_p8)  ;;  %v668_v10 = vld [vmem:[#allocation3 + $0x38] sm:$0xff] (!%p1890_p8)  ;;  %v1898_v3 = vcombine.low (!%p1890_p8), %v2530_v15, %v2535_v16  ;;  %v669_v12 = vld [vmem:[#allocation2] sm:$0xff] (!%p1890_p8) }
 0x117   : > { %2078 = vmatprep.subr.bf16.mxu0 (!%p1890_p8), %v662_v34  ;;  %2253 = vmatprep.subr.bf16.mxu1 (!%p1890_p8), %v662_v34  ;;  %v671_v4 = vld [vmem:[#allocation2 + $0x10] sm:$0xff] (!%p1890_p8)  ;;  %v677_v44 = vld [vmem:[#allocation2 + $0x40] sm:$0xff] (!%p1890_p8)  ;;  %v672_v45 = vld [vmem:[#allocation2 + $0x18] sm:$0xff] (!%p1890_p8) }
 0x118   : > { %2092 = vmatprep.mubr.bf16.mxu0 (!%p1890_p8), %v1891_v35  ;;  %2100 = vmatprep.mubr.bf16.mxu1 (!%p1890_p8), %v1895_v36  ;;  %v679_v11 = vld [vmem:[#allocation2 + $0x50] sm:$0xff] (!%p1890_p8)  ;;  %v680_v13 = vld [vmem:[#allocation2 + $0x58] sm:$0xff] (!%p1890_p8)  ;;  %v670_v49 = vld [vmem:[#allocation2 + $0x8] sm:$0xff] (!%p1890_p8) }
 0x119   : > { %v678_v50 = vld [vmem:[#allocation2 + $0x48] sm:$0xff] (!%p1890_p8)  ;;  %v675_v57 = vld [vmem:[#allocation2 + $0x30] sm:$0xff] (!%p1890_p8)  ;;  %v673_v59 = vld [vmem:[#allocation2 + $0x20] sm:$0xff] (!%p1890_p8) }
 0x11a   : > { %2079 = vmatpush3.bf16.msra.mxu0 (!%p1890_p8), %v662_v34  ;;  %2261 = vmatpush3.bf16.msra.mxu1 (!%p1890_p8), %v662_v34  ;;  %v683_v58 = vld [vmem:[#allocation2 + $0x70] sm:$0xff] (!%p1890_p8)  ;;  %v681_v60 = vld [vmem:[#allocation2 + $0x60] sm:$0xff] (!%p1890_p8)  ;;  %v676_v63 = vld [vmem:[#allocation2 + $0x38] sm:$0xff] (!%p1890_p8) }
 0x11b   : > { %2080 = vmatprep.subr.bf16.mxu0 (!%p1890_p8), %v663_v37  ;;  %2254 = vmatprep.subr.bf16.mxu1 (!%p1890_p8), %v663_v37  ;;  %v684_v2 = vld [vmem:[#allocation2 + $0x78] sm:$0xff] (!%p1890_p8)  ;;  %v674_v21 = vld [vmem:[#allocation2 + $0x28] sm:$0xff] (!%p1890_p8) }
 0x11c   : > { %v682_v22 = vld [vmem:[#allocation2 + $0x68] sm:$0xff] }
 0x11e   : > { %2081 = vmatpush3.bf16.msra.mxu0 %v663_v37  ;;  %2262 = vmatpush3.bf16.msra.mxu1 %v663_v37 }
 0x11f   : > { %2082 = vmatprep.subr.bf16.mxu0 %v664_v38  ;;  %2255 = vmatprep.subr.bf16.mxu1 %v664_v38 }
 0x122   : > { %2083 = vmatpush3.bf16.msra.mxu0 %v664_v38  ;;  %2263 = vmatpush3.bf16.msra.mxu1 %v664_v38 }
 0x123   : > { %2084 = vmatprep.subr.bf16.mxu0 %v665_v0  ;;  %2256 = vmatprep.subr.bf16.mxu1 %v665_v0 }
 0x126   : > { %2085 = vmatpush3.bf16.msra.mxu0 %v665_v0  ;;  %2264 = vmatpush3.bf16.msra.mxu1 %v665_v0 }
 0x127   : > { %2086 = vmatprep.subr.bf16.mxu0 %v666_v1  ;;  %2257 = vmatprep.subr.bf16.mxu1 %v666_v1 }
 0x12a   : > { %2087 = vmatpush3.bf16.msra.mxu0 %v666_v1  ;;  %2265 = vmatpush3.bf16.msra.mxu1 %v666_v1 }
 0x12b   : > { %2088 = vmatprep.subr.bf16.mxu0 %v667_v9  ;;  %2258 = vmatprep.subr.bf16.mxu1 %v667_v9 }
 0x12e   : > { %2089 = vmatpush3.bf16.msra.mxu0 %v667_v9  ;;  %2266 = vmatpush3.bf16.msra.mxu1 %v667_v9 }
 0x12f   : > { %2090 = vmatprep.subr.bf16.mxu0 %v668_v10  ;;  %2259 = vmatprep.subr.bf16.mxu1 %v668_v10 }
 0x132   : > { %2091 = vmatpush3.bf16.msra.mxu0 %v668_v10  ;;  %2267 = vmatpush3.bf16.msra.mxu1 %v668_v10 }
 0x135   : > { %2093 = vmatmul.mubr.bf16.vlgmr.msra.gmra.mrb[0].mxu0 %v1892_v39  ;;  %2101 = vmatmul.mubr.bf16.vlgmr.msra.gmra.mrb[0].mxu1 %v1896_v40 }
 0x136   : > { %2096 = vmatprep.mubr.bf16.mxu0 %v1893_v41  ;;  %2104 = vmatprep.mubr.bf16.mxu1 %v1897_v42 }
 0x13d   : > { %2097 = vmatmul.mubr.bf16.gmra.mrb[4].mxu0 %v1894_v43  ;;  %2105 = vmatmul.mubr.bf16.gmra.mrb[4].mxu1 %v1898_v3 }
 0x208   : > { %v2094_v5 = vpop.f32.mrb[0].mxu0  ;;  %v2102_v6 = vpop.f32.mrb[0].mxu1 }
 0x209   : > { %v832_v14 = vadd.f32 %v2094_v5, %v671_v4  ;;  %v840_v46 = vadd.f32 %v2102_v6, %v679_v11  ;;  %v767_v47 = vpop.f32.mrb[1].mxu0  ;;  %v799_v48 = vpop.f32.mrb[1].mxu1 }
 0x20a   : > { %v830_v7 = vadd.f32 %v767_v47, %v669_v12  ;;  %v838_v8 = vadd.f32 %v799_v48, %v677_v44  ;;  %v2095_v51 = vpop.f32.mrb[2].mxu0  ;;  %v2103_v15 = vpop.f32.mrb[2].mxu1 }
 0x20b   : > { %848 = vst [vmem:[#allocation2 + $0x10] sm:$0xff] %v832_v14  ;;  %856 = vst [vmem:[#allocation2 + $0x50] sm:$0xff] %v840_v46  ;;  %v833_v16 = vadd.f32 %v2095_v51, %v672_v45  ;;  %v841_v52 = vadd.f32 %v2103_v15, %v680_v13  ;;  %v770_v53 = vpop.f32.mrb[3].mxu0  ;;  %v802_v54 = vpop.f32.mrb[3].mxu1 }
 0x20c   : > { %846 = vst [vmem:[#allocation2] sm:$0xff] %v830_v7  ;;  %854 = vst [vmem:[#allocation2 + $0x40] sm:$0xff] %v838_v8  ;;  %v831_v55 = vadd.f32 %v770_v53, %v670_v49  ;;  %v839_v56 = vadd.f32 %v802_v54, %v678_v50 }
 0x20d   : > { %849 = vst [vmem:[#allocation2 + $0x18] sm:$0xff] %v833_v16  ;;  %857 = vst [vmem:[#allocation2 + $0x58] sm:$0xff] %v841_v52 }
 0x20e   : > { %847 = vst [vmem:[#allocation2 + $0x8] sm:$0xff] %v831_v55  ;;  %855 = vst [vmem:[#allocation2 + $0x48] sm:$0xff] %v839_v56 }
 0x210   : > { %v2098_v61 = vpop.f32.mrb[4].mxu0  ;;  %v2106_v62 = vpop.f32.mrb[4].mxu1 }
 0x211   : > { %v836_v17 = vadd.f32 %v2098_v61, %v675_v57  ;;  %v844_v18 = vadd.f32 %v2106_v62, %v683_v58  ;;  %v783_v19 = vpop.f32.mrb[5].mxu0  ;;  %v815_v20 = vpop.f32.mrb[5].mxu1 }
 0x212   : > { %v834_v23 = vadd.f32 %v783_v19, %v673_v59  ;;  %v842_v24 = vadd.f32 %v815_v20, %v681_v60  ;;  %v2099_v25 = vpop.f32.mrb[6].mxu0  ;;  %v2107_v26 = vpop.f32.mrb[6].mxu1 }
 0x213   : > { %852 = vst [vmem:[#allocation2 + $0x30] sm:$0xff] %v836_v17  ;;  %860 = vst [vmem:[#allocation2 + $0x70] sm:$0xff] %v844_v18  ;;  %v837_v27 = vadd.f32 %v2099_v25, %v676_v63  ;;  %v845_v28 = vadd.f32 %v2107_v26, %v684_v2  ;;  %v786_v29 = vpop.f32.mrb[7].mxu0  ;;  %v818_v30 = vpop.f32.mrb[7].mxu1 }
 0x214   : > { %850 = vst [vmem:[#allocation2 + $0x20] sm:$0xff] %v834_v23  ;;  %858 = vst [vmem:[#allocation2 + $0x60] sm:$0xff] %v842_v24  ;;  %v835_v31 = vadd.f32 %v786_v29, %v674_v21  ;;  %v843_v32 = vadd.f32 %v818_v30, %v682_v22 }
 0x215   : > { %853 = vst [vmem:[#allocation2 + $0x38] sm:$0xff] %v837_v27  ;;  %861 = vst [vmem:[#allocation2 + $0x78] sm:$0xff] %v845_v28 }
 0x216   : > { %851 = vst [vmem:[#allocation2 + $0x28] sm:$0xff] %v835_v31  ;;  %859 = vst [vmem:[#allocation2 + $0x68] sm:$0xff] %v843_v32 }
 0x217 PF: > { %865 = sbr.rel (!%p386_p5) target bundleno = 1096 (0x448), region = 68  ;;  %v2317_v33 = vld [vmem:[%s2780_s3] sm:$0xff] (%p386_p5)   ;;  %v2318_v34 = vld [vmem:[%s2780_s3 + $0x8] sm:$0xff] (%p386_p5)   ;;  %v2319_v35 = vld [vmem:[%s2780_s3 + $0x10] sm:$0xff] (%p386_p5)  }
 0x218   : > { %2108 = vmatprep.subr.bf16.mxu0 (%p386_p5), %v2317_v33  ;;  %v2320_v36 = vld [vmem:[%s2780_s3 + $0x18] sm:$0xff] (%p386_p5)   ;;  %v887_v37 = vld [vmem:[#allocation2] sm:$0xff] (%p386_p5)  ;;  %v888_v38 = vld [vmem:[#allocation2 + $0x8] sm:$0xff] (%p386_p5) }
 0x219   : > { %2109 = vmatpush3.bf16.msra.mxu0 (%p386_p5), %v2317_v33  ;;  %v903_v0 = vpack.c.bf16 (%p386_p5), %v888_v38, %v887_v37  ;;  %v2321_v1 = vld [vmem:[%s2780_s3 + $0x20] sm:$0xff] (%p386_p5)   ;;  %v2322_v9 = vld [vmem:[%s2780_s3 + $0x28] sm:$0xff] (%p386_p5)   ;;  %v2323_v10 = vld [vmem:[%s2780_s3 + $0x30] sm:$0xff] (%p386_p5)  }
 0x21a   : > { %2110 = vmatprep.subr.bf16.mxu0 (%p386_p5), %v2318_v34  ;;  %v2324_v39 = vld [vmem:[%s2780_s3 + $0x38] sm:$0xff] (%p386_p5)   ;;  %v889_v40 = vld [vmem:[#allocation2 + $0x10] sm:$0xff] (%p386_p5)  ;;  %v2325_v42 = vld [vmem:[%s2779_s2] sm:$0xff] (%p386_p5)  }
 0x21b   : > { %2124 = vmatprep.mubr.bf16.mxu0 (%p386_p5), %v903_v0  ;;  %v890_v41 = vld [vmem:[#allocation2 + $0x18] sm:$0xff] (%p386_p5)  ;;  %v891_v43 = vld [vmem:[#allocation2 + $0x20] sm:$0xff] (%p386_p5)  ;;  %v2342_v44 = vld [vmem:[%s2783_s6 + $0x8] sm:$0xff] (%p386_p5)  }
 0x21c   : > { %v904_v4 = vpack.c.bf16 (%p386_p5), %v890_v41, %v889_v40  ;;  %v2341_v11 = vld [vmem:[%s2783_s6] sm:$0xff] (%p386_p5)   ;;  %v2326_v5 = vld [vmem:[%s2779_s2 + $0x8] sm:$0xff] (%p386_p5)   ;;  %v893_v6 = vld [vmem:[#allocation2 + $0x30] sm:$0xff] (%p386_p5) }
 0x21d   : > { %2111 = vmatpush3.bf16.msra.mxu0 (%p386_p5), %v2318_v34  ;;  %v892_v3 = vld [vmem:[#allocation2 + $0x28] sm:$0xff] (%p386_p5)  ;;  %2172 = vmatprep.subr.bf16.mxu1 (%p386_p5), %v2341_v11  ;;  %v894_v45 = vld [vmem:[#allocation2 + $0x38] sm:$0xff] (%p386_p5)  ;;  %v2327_v13 = vld [vmem:[%s2779_s2 + $0x10] sm:$0xff] (%p386_p5)  }
 0x21e   : > { %2112 = vmatprep.subr.bf16.mxu0 %v2319_v35  ;;  %v905_v12 = vpack.c.bf16 %v892_v3, %v891_v43  ;;  %2173 = vmatpush3.bf16.msra.mxu1 %v2341_v11  ;;  %v895_v14 = vld [vmem:[#allocation2 + $0x40] sm:$0xff]  ;;  %v2343_v46 = vld [vmem:[%s2783_s6 + $0x10] sm:$0xff]   ;;  %v896_v47 = vld [vmem:[#allocation2 + $0x48] sm:$0xff]  ;;  %v906_v49 = vpack.c.bf16 %v894_v45, %v893_v6 }
 0x21f   : > { %2174 = vmatprep.subr.bf16.mxu1 %v2342_v44  ;;  %v2344_v48 = vld [vmem:[%s2783_s6 + $0x18] sm:$0xff]   ;;  %v907_v7 = vpack.c.bf16 %v896_v47, %v895_v14  ;;  %v2345_v8 = vld [vmem:[%s2783_s6 + $0x20] sm:$0xff]   ;;  %v897_v51 = vld [vmem:[#allocation2 + $0x50] sm:$0xff] }
 0x220   : > { %v2328_v50 = vld [vmem:[%s2779_s2 + $0x18] sm:$0xff]   ;;  %v2329_v16 = vld [vmem:[%s2779_s2 + $0x20] sm:$0xff]   ;;  %v900_v53 = vld [vmem:[#allocation2 + $0x68] sm:$0xff] }
 0x221   : > { %2113 = vmatpush3.bf16.msra.mxu0 %v2319_v35  ;;  %v898_v15 = vld [vmem:[#allocation2 + $0x58] sm:$0xff]  ;;  %v899_v52 = vld [vmem:[#allocation2 + $0x60] sm:$0xff]  ;;  %v2346_v55 = vld [vmem:[%s2783_s6 + $0x28] sm:$0xff]  }
 0x222   : > { %2114 = vmatprep.subr.bf16.mxu0 %v2320_v36  ;;  %2175 = vmatpush3.bf16.msra.mxu1 %v2342_v44  ;;  %v908_v54 = vpack.c.bf16 %v898_v15, %v897_v51  ;;  %v909_v56 = vpack.c.bf16 %v900_v53, %v899_v52  ;;  %v2330_v57 = vld [vmem:[%s2779_s2 + $0x28] sm:$0xff]   ;;  %v901_v58 = vld [vmem:[#allocation2 + $0x70] sm:$0xff]  ;;  %v902_v59 = vld [vmem:[#allocation2 + $0x78] sm:$0xff] }
 0x223   : > { %2176 = vmatprep.subr.bf16.mxu1 %v2343_v46  ;;  %v2331_v60 = vld [vmem:[%s2779_s2 + $0x30] sm:$0xff]   ;;  %v910_v61 = vpack.c.bf16 %v902_v59, %v901_v58  ;;  %v2333_v62 = vld [vmem:[%s2778_s1] sm:$0xff]   ;;  %v2332_v63 = vld [vmem:[%s2779_s2 + $0x38] sm:$0xff]  }
 0x224   : > { %v2334_v2 = vld [vmem:[%s2778_s1 + $0x8] sm:$0xff]   ;;  %v2335_v17 = vld [vmem:[%s2778_s1 + $0x10] sm:$0xff]   ;;  %v2336_v18 = vld [vmem:[%s2778_s1 + $0x18] sm:$0xff]  }
 0x225   : > { %2115 = vmatpush3.bf16.msra.mxu0 %v2320_v36  ;;  %v2337_v19 = vld [vmem:[%s2778_s1 + $0x20] sm:$0xff]   ;;  %v2338_v20 = vld [vmem:[%s2778_s1 + $0x28] sm:$0xff]   ;;  %v2339_v21 = vld [vmem:[%s2778_s1 + $0x30] sm:$0xff]  }
 0x226   : > { %2116 = vmatprep.subr.bf16.mxu0 %v2321_v1  ;;  %2177 = vmatpush3.bf16.msra.mxu1 %v2343_v46  ;;  %v2340_v22 = vld [vmem:[%s2778_s1 + $0x38] sm:$0xff]   ;;  %v2347_v23 = vld [vmem:[%s2783_s6 + $0x30] sm:$0xff]   ;;  %v2349_v25 = vld [vmem:[%s2782_s5] sm:$0xff]  }
 0x227   : > { %2178 = vmatprep.subr.bf16.mxu1 %v2344_v48  ;;  %v2348_v24 = vld [vmem:[%s2783_s6 + $0x38] sm:$0xff]   ;;  %v2700_v26 = vld [vmem:[%s2781_s4] ss:$0 sm:$0xff]  ;;  %v2350_v40 = vld [vmem:[%s2782_s5 + $0x8] sm:$0xff]  }
 0x228   : > { %v2351_v44 = vld [vmem:[%s2782_s5 + $0x10] sm:$0xff]   ;;  %v2353_v52 = vld [vmem:[%s2782_s5 + $0x20] sm:$0xff]  }
 0x229   : > { %2117 = vmatpush3.bf16.msra.mxu0 %v2321_v1 }
 0x22a   : > { %2118 = vmatprep.subr.bf16.mxu0 %v2322_v9  ;;  %2179 = vmatpush3.bf16.msra.mxu1 %v2344_v48  ;;  %v2352_v48 = vld [vmem:[%s2782_s5 + $0x18] sm:$0xff]  }
 0x22b   : > { %2180 = vmatprep.subr.bf16.mxu1 %v2345_v8 }
 0x22d   : > { %2119 = vmatpush3.bf16.msra.mxu0 %v2322_v9 }
 0x22e   : > { %2120 = vmatprep.subr.bf16.mxu0 %v2323_v10  ;;  %2181 = vmatpush3.bf16.msra.mxu1 %v2345_v8 }
 0x22f   : > { %2182 = vmatprep.subr.bf16.mxu1 %v2346_v55 }
 0x231   : > { %2121 = vmatpush3.bf16.msra.mxu0 %v2323_v10 }
 0x232   : > { %2122 = vmatprep.subr.bf16.mxu0 %v2324_v39  ;;  %2183 = vmatpush3.bf16.msra.mxu1 %v2346_v55 }
 0x233   : > { %2184 = vmatprep.subr.bf16.mxu1 %v2347_v23 }
 0x235   : > { %2123 = vmatpush3.bf16.msra.mxu0 %v2324_v39 }
 0x236   : > { %2140 = vmatprep.subr.bf16.mxu0 %v2325_v42  ;;  %2185 = vmatpush3.bf16.msra.mxu1 %v2347_v23 }
 0x237   : > { %2186 = vmatprep.subr.bf16.mxu1 %v2348_v24 }
 0x238   : > { %2125 = vmatmul.mubr.bf16.vlgmr.msra.gmra.mrb[0].mxu0 %v904_v4 }
 0x239   : > { %2141 = vmatpush3.bf16.msra.mxu0 %v2325_v42  ;;  %2128 = vmatprep.mubr.bf16.mxu0 %v905_v12 }
 0x23a   : > { %2142 = vmatprep.subr.bf16.mxu0 %v2326_v5  ;;  %2187 = vmatpush3.bf16.msra.mxu1 %v2348_v24 }
 0x23b   : > { %2204 = vmatprep.subr.bf16.mxu1 %v2349_v25 }
 0x23d   : > { %2143 = vmatpush3.bf16.msra.mxu0 %v2326_v5 }
 0x23e   : > { %2144 = vmatprep.subr.bf16.mxu0 %v2327_v13 }
 0x240   : > { %2129 = vmatmul.mubr.bf16.gmra.mrb[4].mxu0 %v906_v49 }
 0x241   : > { %2145 = vmatpush3.bf16.msra.mxu0 %v2327_v13  ;;  %2132 = vmatprep.mubr.bf16.mxu0 %v907_v7 }
 0x242   : > { %2146 = vmatprep.subr.bf16.mxu0 %v2328_v50 }
 0x245   : > { %2147 = vmatpush3.bf16.msra.mxu0 %v2328_v50 }
 0x246   : > { %2148 = vmatprep.subr.bf16.mxu0 %v2329_v16 }
 0x248   : > { %2133 = vmatmul.mubr.bf16.gmra.mrb[8].mxu0 %v908_v54 }
 0x249   : > { %2149 = vmatpush3.bf16.msra.mxu0 %v2329_v16  ;;  %2136 = vmatprep.mubr.bf16.mxu0 %v909_v56 }
 0x24a   : > { %2150 = vmatprep.subr.bf16.mxu0 %v2330_v57 }
 0x24d   : > { %2151 = vmatpush3.bf16.msra.mxu0 %v2330_v57 }
 0x24e   : > { %2152 = vmatprep.subr.bf16.mxu0 %v2331_v60 }
 0x250   : > { %2137 = vmatmul.mubr.bf16.gmra.mrb[12].mxu0 %v910_v61 }
 0x251   : > { %2153 = vmatpush3.bf16.msra.mxu0 %v2331_v60  ;;  %2156 = vmatprep.mubr.bf16.mxu0 %v2333_v62  ;;  %v2354_v60 = vld [vmem:[%s2782_s5 + $0x28] sm:$0xff]  }
 0x252   : > { %2154 = vmatprep.subr.bf16.mxu0 %v2332_v63 }
 0x255   : > { %2155 = vmatpush3.bf16.msra.mxu0 %v2332_v63 }
 0x258   : > { %2157 = vmatmul.mubr.bf16.vlgmr.msra.gmra.mrb[0].mxu0 %v2334_v2 }
 0x259   : > { %2160 = vmatprep.mubr.bf16.mxu0 %v2335_v17 }
 0x260   : > { %2161 = vmatmul.mubr.bf16.gmra.mrb[4].mxu0 %v2336_v18 }
 0x261   : > { %2164 = vmatprep.mubr.bf16.mxu0 %v2337_v19 }
 0x268   : > { %2165 = vmatmul.mubr.bf16.gmra.mrb[8].mxu0 %v2338_v20  ;;  %v2355_v20 = vld [vmem:[%s2782_s5 + $0x30] sm:$0xff]  }
 0x269   : > { %2168 = vmatprep.mubr.bf16.mxu0 %v2339_v21 }
 0x270   : > { %2169 = vmatmul.mubr.bf16.gmra.mrb[12].mxu0 %v2340_v22 }
 0x32b   : > { %v2158_v27 = vpop.f32.mrb[0].mxu0 }
 0x32c   : > { %v1290_v28 = vadd.f32 %v2158_v27, %v2700_v26  ;;  %v1218_v29 = vpop.f32.mrb[1].mxu0 }
 0x32d   : > { %v1288_v30 = vadd.f32 %v2700_v26, %v1218_v29  ;;  %v2159_v31 = vpop.f32.mrb[2].mxu0 }
 0x32e   : > { %v1291_v32 = vadd.f32 %v2159_v31, %v2700_v26  ;;  %v1221_v33 = vpop.f32.mrb[3].mxu0  ;;  %v1306_v35 = vmax.f32 %v1290_v28, 0.0 }
 0x32f   : > { %v1289_v34 = vadd.f32 %v2700_v26, %v1221_v33  ;;  %v1304_v37 = vmax.f32 %v1288_v30, 0.0 }
 0x330   : > { %v1307_v36 = vmax.f32 %v1291_v32, 0.0 }
 0x331   : > { %v1305_v38 = vmax.f32 %v1289_v34, 0.0 }
 0x332   : > { %v2706_v0 = vpack.c.bf16 %v1307_v36, %v1306_v35 }
 0x333   : > { %v2162_v1 = vpop.f32.mrb[4].mxu0  ;;  %v2708_v9 = vpack.c.bf16 %v1305_v38, %v1304_v37 }
 0x334   : > { %v1294_v10 = vadd.f32 %v2162_v1, %v2700_v26  ;;  %v1234_v39 = vpop.f32.mrb[5].mxu0 }
 0x335   : > { %v1292_v41 = vadd.f32 %v2700_v26, %v1234_v39  ;;  %v2163_v42 = vpop.f32.mrb[6].mxu0  ;;  %2188 = vmatprep.mubr.bf16.mxu1 %v2708_v9 }
 0x336   : > { %v1295_v43 = vadd.f32 %v2163_v42, %v2700_v26  ;;  %v1237_v3 = vpop.f32.mrb[7].mxu0  ;;  %2189 = vmatmul.mubr.bf16.vlgmr.msra.gmra.mrb[0].mxu1 %v2706_v0  ;;  %v1310_v11 = vmax.f32 %v1294_v10, 0.0 }
 0x337   : > { %v1293_v4 = vadd.f32 %v2700_v26, %v1237_v3  ;;  %2205 = vmatpush3.bf16.msra.mxu1 %v2349_v25  ;;  %v1308_v5 = vmax.f32 %v1292_v41, 0.0  ;;  %v2356_v25 = vld [vmem:[%s2782_s5 + $0x38] sm:$0xff]  }
 0x338   : > { %v1311_v12 = vmax.f32 %v1295_v43, 0.0  ;;  %2206 = vmatprep.subr.bf16.mxu1 %v2350_v40 }
 0x339   : > { %v1309_v6 = vmax.f32 %v1293_v4, 0.0 }
 0x33a   : > { %v1323_v45 = vpack.c.bf16 %v1311_v12, %v1310_v11  ;;  %v1933_v11 = vld [vmem:[%s2784_s7] ss:$0 sm:$0xff] }
 0x33b   : > { %v1322_v13 = vpack.c.bf16 %v1309_v6, %v1308_v5  ;;  %v2166_v14 = vpop.f32.mrb[8].mxu0  ;;  %2207 = vmatpush3.bf16.msra.mxu1 %v2350_v40 }
 0x33c   : > { %v1298_v46 = vadd.f32 %v2166_v14, %v2700_v26  ;;  %v1250_v47 = vpop.f32.mrb[9].mxu0  ;;  %2208 = vmatprep.subr.bf16.mxu1 %v2351_v44 }
 0x33d   : > { %v1296_v49 = vadd.f32 %v2700_v26, %v1250_v47  ;;  %v2167_v50 = vpop.f32.mrb[10].mxu0  ;;  %2192 = vmatprep.mubr.bf16.mxu1 %v1322_v13 }
 0x33e   : > { %v1299_v7 = vadd.f32 %v2167_v50, %v2700_v26  ;;  %v1253_v8 = vpop.f32.mrb[11].mxu0  ;;  %2193 = vmatmul.mubr.bf16.gmra.mrb[4].mxu1 %v1323_v45  ;;  %v1314_v15 = vmax.f32 %v1298_v46, 0.0 }
 0x33f   : > { %v1297_v51 = vadd.f32 %v2700_v26, %v1253_v8  ;;  %2209 = vmatpush3.bf16.msra.mxu1 %v2351_v44  ;;  %v1312_v53 = vmax.f32 %v1296_v49, 0.0 }
 0x340   : > { %v1315_v16 = vmax.f32 %v1299_v7, 0.0  ;;  %2210 = vmatprep.subr.bf16.mxu1 %v2352_v48 }
 0x341   : > { %v1313_v54 = vmax.f32 %v1297_v51, 0.0 }
 0x342   : > { %v1325_v55 = vpack.c.bf16 %v1315_v16, %v1314_v15 }
 0x343   : > { %v1324_v56 = vpack.c.bf16 %v1313_v54, %v1312_v53  ;;  %v2170_v57 = vpop.f32.mrb[12].mxu0  ;;  %2211 = vmatpush3.bf16.msra.mxu1 %v2352_v48 }
 0x344   : > { %v1302_v58 = vadd.f32 %v2170_v57, %v2700_v26  ;;  %v1266_v59 = vpop.f32.mrb[13].mxu0  ;;  %2212 = vmatprep.subr.bf16.mxu1 %v2353_v52 }
 0x345   : > { %v1300_v61 = vadd.f32 %v2700_v26, %v1266_v59  ;;  %v2171_v62 = vpop.f32.mrb[14].mxu0  ;;  %2196 = vmatprep.mubr.bf16.mxu1 %v1324_v56 }
 0x346   : > { %v1303_v63 = vadd.f32 %v2171_v62, %v2700_v26  ;;  %v1269_v2 = vpop.f32.mrb[15].mxu0  ;;  %2197 = vmatmul.mubr.bf16.gmra.mrb[8].mxu1 %v1325_v55  ;;  %v1318_v18 = vmax.f32 %v1302_v58, 0.0 }
 0x347   : > { %v1301_v17 = vadd.f32 %v2700_v26, %v1269_v2  ;;  %2213 = vmatpush3.bf16.msra.mxu1 %v2353_v52  ;;  %v1316_v21 = vmax.f32 %v1300_v61, 0.0 }
 0x348   : > { %v1319_v19 = vmax.f32 %v1303_v63, 0.0  ;;  %2214 = vmatprep.subr.bf16.mxu1 %v2354_v60 }
 0x349   : > { %v1317_v22 = vmax.f32 %v1301_v17, 0.0 }
 0x34a   : > { %v1327_v23 = vpack.c.bf16 %v1319_v19, %v1318_v18 }
 0x34b   : > { %v1326_v24 = vpack.c.bf16 %v1317_v22, %v1316_v21  ;;  %2215 = vmatpush3.bf16.msra.mxu1 %v2354_v60 }
 0x34c   : > { %2216 = vmatprep.subr.bf16.mxu1 %v2355_v20 }
 0x34d   : > { %2200 = vmatprep.mubr.bf16.mxu1 %v1326_v24 }
 0x34e   : > { %2201 = vmatmul.mubr.bf16.gmra.mrb[12].mxu1 %v1327_v23 }
 0x34f   : > { %2217 = vmatpush3.bf16.msra.mxu1 %v2355_v20  ;;  %2220 = vmatprep.mubr.bf16.mxu1 %v2708_v9 }
 0x350   : > { %2218 = vmatprep.subr.bf16.mxu1 %v2356_v25 }
 0x353   : > { %2219 = vmatpush3.bf16.msra.mxu1 %v2356_v25 }
 0x356   : > { %2221 = vmatmul.mubr.bf16.vlgmr.msra.gmra.mrb[16].mxu1 %v2706_v0 }
 0x357   : > { %2224 = vmatprep.mubr.bf16.mxu1 %v1322_v13 }
 0x35e   : > { %2225 = vmatmul.mubr.bf16.gmra.mrb[20].mxu1 %v1323_v45 }
 0x35f   : > { %2228 = vmatprep.mubr.bf16.mxu1 %v1324_v56 }
 0x366   : > { %2229 = vmatmul.mubr.bf16.gmra.mrb[24].mxu1 %v1325_v55 }
 0x367   : > { %2232 = vmatprep.mubr.bf16.mxu1 %v1326_v24 }
 0x36e   : > { %2233 = vmatmul.mubr.bf16.gmra.mrb[28].mxu1 %v1327_v23 }
 0x409   : > { %v2190_v26 = vpop.f32.mrb[0].mxu1 }
 0x40a   : > { %v1426_v27 = vpop.f32.mrb[1].mxu1 }
 0x40b   : > { %v2191_v28 = vpop.f32.mrb[2].mxu1 }
 0x40c   : > { %v1490_v29 = vpack.c.bf16 %v2191_v28, %v2190_v26  ;;  %v1429_v30 = vpop.f32.mrb[3].mxu1 }
 0x40d   : > { %v1489_v31 = vpack.c.bf16 %v1429_v30, %v1426_v27 }
 0x40e   : > { %1502 = vst [vmem:[#allocation3 + $0x8] sm:$0xff] %v1490_v29 }
 0x40f   : > { %1501 = vst [vmem:[#allocation3] sm:$0xff] %v1489_v31 }
 0x411   : > { %v2194_v32 = vpop.f32.mrb[4].mxu1 }
 0x412   : > { %v1442_v33 = vpop.f32.mrb[5].mxu1 }
 0x413   : > { %v2195_v34 = vpop.f32.mrb[6].mxu1 }
 0x414   : > { %v1492_v35 = vpack.c.bf16 %v2195_v34, %v2194_v32  ;;  %v1445_v36 = vpop.f32.mrb[7].mxu1 }
 0x415   : > { %v1491_v37 = vpack.c.bf16 %v1445_v36, %v1442_v33 }
 0x416   : > { %1504 = vst [vmem:[#allocation3 + $0x18] sm:$0xff] %v1492_v35 }
 0x417   : > { %1503 = vst [vmem:[#allocation3 + $0x10] sm:$0xff] %v1491_v37 }
 0x419   : > { %v2198_v38 = vpop.f32.mrb[8].mxu1 }
 0x41a   : > { %v1458_v0 = vpop.f32.mrb[9].mxu1 }
 0x41b   : > { %v2199_v1 = vpop.f32.mrb[10].mxu1 }
 0x41c   : > { %v1494_v9 = vpack.c.bf16 %v2199_v1, %v2198_v38  ;;  %v1461_v10 = vpop.f32.mrb[11].mxu1 }
 0x41d   : > { %v1493_v39 = vpack.c.bf16 %v1461_v10, %v1458_v0 }
 0x41e   : > { %1506 = vst [vmem:[#allocation3 + $0x28] sm:$0xff] %v1494_v9 }
 0x41f   : > { %1505 = vst [vmem:[#allocation3 + $0x20] sm:$0xff] %v1493_v39 }
 0x421   : > { %v2202_v40 = vpop.f32.mrb[12].mxu1 }
 0x422   : > { %v1474_v41 = vpop.f32.mrb[13].mxu1 }
 0x423   : > { %v2203_v42 = vpop.f32.mrb[14].mxu1 }
 0x424   : > { %v1496_v43 = vpack.c.bf16 %v2203_v42, %v2202_v40  ;;  %v1477_v3 = vpop.f32.mrb[15].mxu1 }
 0x425   : > { %v1495_v4 = vpack.c.bf16 %v1477_v3, %v1474_v41 }
 0x426   : > { %1508 = vst [vmem:[#allocation3 + $0x38] sm:$0xff] %v1496_v43 }
 0x427   : > { %1507 = vst [vmem:[#allocation3 + $0x30] sm:$0xff] %v1495_v4 }
 0x429   : > { %v2222_v12 = vpop.f32.mrb[16].mxu1 }
 0x42a   : > { %v1623_v44 = vadd.f32 %v2222_v12, %v1933_v11  ;;  %v1614_v5 = vpop.f32.mrb[17].mxu1 }
 0x42b   : > { %v1615_v6 = vadd.f32 %v1933_v11, %v1614_v5  ;;  %v2223_v45 = vpop.f32.mrb[18].mxu1 }
 0x42c   : > { %1680 = vst [vmem:[#allocation4 + $0x10] sm:$0xff] %v1623_v44  ;;  %v1626_v13 = vadd.f32 %v2223_v45, %v1933_v11  ;;  %v1617_v14 = vpop.f32.mrb[19].mxu1 }
 0x42d   : > { %1678 = vst [vmem:[#allocation4] sm:$0xff] %v1615_v6  ;;  %v1618_v46 = vadd.f32 %v1933_v11, %v1617_v14 }
 0x42e   : > { %1681 = vst [vmem:[#allocation4 + $0x18] sm:$0xff] %v1626_v13 }
 0x42f   : > { %1679 = vst [vmem:[#allocation4 + $0x8] sm:$0xff] %v1618_v46 }
 0x431   : > { %v2226_v47 = vpop.f32.mrb[20].mxu1 }
 0x432   : > { %v1639_v48 = vadd.f32 %v2226_v47, %v1933_v11  ;;  %v1630_v49 = vpop.f32.mrb[21].mxu1 }
 0x433   : > { %v1631_v50 = vadd.f32 %v1933_v11, %v1630_v49  ;;  %v2227_v7 = vpop.f32.mrb[22].mxu1 }
 0x434   : > { %1684 = vst [vmem:[#allocation4 + $0x30] sm:$0xff] %v1639_v48  ;;  %v1642_v8 = vadd.f32 %v2227_v7, %v1933_v11  ;;  %v1633_v51 = vpop.f32.mrb[23].mxu1 }
 0x435   : > { %1682 = vst [vmem:[#allocation4 + $0x20] sm:$0xff] %v1631_v50  ;;  %v1634_v15 = vadd.f32 %v1933_v11, %v1633_v51 }
 0x436   : > { %1685 = vst [vmem:[#allocation4 + $0x38] sm:$0xff] %v1642_v8 }
 0x437   : > { %1683 = vst [vmem:[#allocation4 + $0x28] sm:$0xff] %v1634_v15 }
 0x439   : > { %v2230_v16 = vpop.f32.mrb[24].mxu1 }
 0x43a   : > { %v1655_v52 = vadd.f32 %v2230_v16, %v1933_v11  ;;  %v1646_v53 = vpop.f32.mrb[25].mxu1 }
 0x43b   : > { %v1647_v54 = vadd.f32 %v1933_v11, %v1646_v53  ;;  %v2231_v55 = vpop.f32.mrb[26].mxu1 }
 0x43c   : > { %1688 = vst [vmem:[#allocation4 + $0x50] sm:$0xff] %v1655_v52  ;;  %v1658_v56 = vadd.f32 %v2231_v55, %v1933_v11  ;;  %v1649_v57 = vpop.f32.mrb[27].mxu1 }
 0x43d   : > { %1686 = vst [vmem:[#allocation4 + $0x40] sm:$0xff] %v1647_v54  ;;  %v1650_v58 = vadd.f32 %v1933_v11, %v1649_v57 }
 0x43e   : > { %1689 = vst [vmem:[#allocation4 + $0x58] sm:$0xff] %v1658_v56 }
 0x43f   : > { %1687 = vst [vmem:[#allocation4 + $0x48] sm:$0xff] %v1650_v58 }
 0x441   : > { %v2234_v59 = vpop.f32.mrb[28].mxu1 }
 0x442   : > { %v1671_v60 = vadd.f32 %v2234_v59, %v1933_v11  ;;  %v1662_v61 = vpop.f32.mrb[29].mxu1 }
 0x443   : > { %v1663_v62 = vadd.f32 %v1933_v11, %v1662_v61  ;;  %v2235_v63 = vpop.f32.mrb[30].mxu1 }
 0x444   : > { %1692 = vst [vmem:[#allocation4 + $0x70] sm:$0xff] %v1671_v60  ;;  %v1674_v2 = vadd.f32 %v2235_v63, %v1933_v11  ;;  %v1665_v17 = vpop.f32.mrb[31].mxu1 }
 0x445   : > { %1690 = vst [vmem:[#allocation4 + $0x60] sm:$0xff] %v1663_v62  ;;  %v1666_v18 = vadd.f32 %v1933_v11, %v1665_v17 }
 0x446   : > { %1693 = vst [vmem:[#allocation4 + $0x78] sm:$0xff] %v1674_v2 }
 0x447   : > { %1691 = vst [vmem:[#allocation4 + $0x68] sm:$0xff] %v1666_v18 }
 0x448 PF: > { %1697 = sbr.rel (!%p652_p7) target bundleno = 1112 (0x458), region = 72  ;;  %v1699_v19 = vld [vmem:[#allocation2] sm:$0xff] (%p652_p7)  ;;  %v1700_v21 = vld [vmem:[#allocation2 + $0x8] sm:$0xff] (%p652_p7)  ;;  %v1701_v24 = vld [vmem:[#allocation2 + $0x10] sm:$0xff] (%p652_p7) }
 0x449   : > { %v1716_v20 = vld [vmem:[#allocation4] sm:$0xff] (%p652_p7)  ;;  %v1717_v23 = vld [vmem:[#allocation4 + $0x8] sm:$0xff] (%p652_p7)  ;;  %v1718_v25 = vld [vmem:[#allocation4 + $0x10] sm:$0xff] (%p652_p7) }
 0x44a   : > { %v1732_v22 = vadd.f32 (%p652_p7), %v1716_v20, %v1699_v19  ;;  %v1733_v26 = vadd.f32 (%p652_p7), %v1717_v23, %v1700_v21  ;;  %v1734_v27 = vadd.f32 (%p652_p7), %v1718_v25, %v1701_v24  ;;  %v1702_v28 = vld [vmem:[#allocation2 + $0x18] sm:$0xff] (%p652_p7)  ;;  %v1703_v30 = vld [vmem:[#allocation2 + $0x20] sm:$0xff] (%p652_p7)  ;;  %v1704_v33 = vld [vmem:[#allocation2 + $0x28] sm:$0xff] (%p652_p7) }
 0x44b   : > { %v1719_v29 = vld [vmem:[#allocation4 + $0x18] sm:$0xff] (%p652_p7)  ;;  %v1720_v32 = vld [vmem:[#allocation4 + $0x20] sm:$0xff] (%p652_p7)  ;;  %v1721_v34 = vld [vmem:[#allocation4 + $0x28] sm:$0xff] (%p652_p7) }
 0x44c   : > { %1748 = vst [vmem:[%s2515_s20] sm:$0xff] (%p652_p7), %v1732_v22  ;;  %v1735_v31 = vadd.f32 (%p652_p7), %v1719_v29, %v1702_v28  ;;  %1749 = vst [vmem:[%s2515_s20 + $0x8] sm:$0xff] (%p652_p7), %v1733_v26  ;;  %v1736_v35 = vadd.f32 (%p652_p7), %v1720_v32, %v1703_v30  ;;  %v1737_v36 = vadd.f32 (%p652_p7), %v1721_v34, %v1704_v33  ;;  %v1705_v37 = vld [vmem:[#allocation2 + $0x30] sm:$0xff] (%p652_p7)  ;;  %v1706_v0 = vld [vmem:[#allocation2 + $0x38] sm:$0xff] (%p652_p7) }
 0x44d   : > { %1750 = vst [vmem:[%s2515_s20 + $0x10] sm:$0xff] (%p652_p7), %v1734_v27  ;;  %v1722_v38 = vld [vmem:[#allocation4 + $0x30] sm:$0xff] (%p652_p7)  ;;  %v1723_v9 = vld [vmem:[#allocation4 + $0x38] sm:$0xff] (%p652_p7)  ;;  %v1707_v10 = vld [vmem:[#allocation2 + $0x40] sm:$0xff] (%p652_p7) }
 0x44e   : > { %1751 = vst [vmem:[%s2515_s20 + $0x18] sm:$0xff] (%p652_p7), %v1735_v31  ;;  %v1738_v1 = vadd.f32 (%p652_p7), %v1722_v38, %v1705_v37  ;;  %v1724_v39 = vld [vmem:[#allocation4 + $0x40] sm:$0xff] (%p652_p7)  ;;  %1752 = vst [vmem:[%s2515_s20 + $0x20] sm:$0xff] (%p652_p7), %v1736_v35  ;;  %v1739_v40 = vadd.f32 (%p652_p7), %v1723_v9, %v1706_v0  ;;  %v1708_v42 = vld [vmem:[#allocation2 + $0x48] sm:$0xff] (%p652_p7) }
 0x44f   : > { %1753 = vst [vmem:[%s2515_s20 + $0x28] sm:$0xff] %v1737_v36  ;;  %v1740_v41 = vadd.f32 %v1724_v39, %v1707_v10  ;;  %v1725_v43 = vld [vmem:[#allocation4 + $0x48] sm:$0xff]  ;;  %v1709_v3 = vld [vmem:[#allocation2 + $0x50] sm:$0xff]  ;;  %v1710_v12 = vld [vmem:[#allocation2 + $0x58] sm:$0xff] }
 0x450   : > { %1754 = vst [vmem:[%s2515_s20 + $0x30] sm:$0xff] %v1738_v1  ;;  %v1741_v4 = vadd.f32 %v1725_v43, %v1708_v42  ;;  %v1726_v11 = vld [vmem:[#allocation4 + $0x50] sm:$0xff]  ;;  %v1727_v44 = vld [vmem:[#allocation4 + $0x58] sm:$0xff]  ;;  %1755 = vst [vmem:[%s2515_s20 + $0x38] sm:$0xff] %v1739_v40 }
 0x451   : > { %1756 = vst [vmem:[%s2515_s20 + $0x40] sm:$0xff] %v1740_v41  ;;  %v1742_v5 = vadd.f32 %v1726_v11, %v1709_v3  ;;  %v1743_v6 = vadd.f32 %v1727_v44, %v1710_v12  ;;  %v1711_v45 = vld [vmem:[#allocation2 + $0x60] sm:$0xff]  ;;  %v1712_v14 = vld [vmem:[#allocation2 + $0x68] sm:$0xff]  ;;  %v1713_v48 = vld [vmem:[#allocation2 + $0x70] sm:$0xff] }
 0x452   : > { %v1728_v13 = vld [vmem:[#allocation4 + $0x60] sm:$0xff]  ;;  %1757 = vst [vmem:[%s2515_s20 + $0x48] sm:$0xff] %v1741_v4  ;;  %v1729_v47 = vld [vmem:[#allocation4 + $0x68] sm:$0xff]  ;;  %v1730_v49 = vld [vmem:[#allocation4 + $0x70] sm:$0xff] }
 0x453   : > { %v1744_v46 = vadd.f32 %v1728_v13, %v1711_v45  ;;  %1758 = vst [vmem:[%s2515_s20 + $0x50] sm:$0xff] %v1742_v5  ;;  %1759 = vst [vmem:[%s2515_s20 + $0x58] sm:$0xff] %v1743_v6  ;;  %v1745_v50 = vadd.f32 %v1729_v47, %v1712_v14  ;;  %v1746_v7 = vadd.f32 %v1730_v49, %v1713_v48  ;;  %v1714_v8 = vld [vmem:[#allocation2 + $0x78] sm:$0xff] }
 0x454   : > { %v1731_v51 = vld [vmem:[#allocation4 + $0x78] sm:$0xff] }
 0x455   : > { %1760 = vst [vmem:[%s2515_s20 + $0x60] sm:$0xff] %v1744_v46  ;;  %v1747_v15 = vadd.f32 %v1731_v51, %v1714_v8  ;;  %1761 = vst [vmem:[%s2515_s20 + $0x68] sm:$0xff] %v1745_v50 }
 0x456   : > { %1762 = vst [vmem:[%s2515_s20 + $0x70] sm:$0xff] %v1746_v7 }
 0x457   : > { %1763 = vst [vmem:[%s2515_s20 + $0x78] sm:$0xff] %v1747_v15 }
 0x458 PF: > { %s18_s29 = sadd.s32 1, %s2379_s29   ;;  %s2786_s27 = smov %s2375_s28 }
 0x459   : > { %p15_p9 = scmp.ge.s32.totalorder %s18_s29, 4   ;;  %s2787_s28 = smov %s2789_s30 }
 0x45b   :  { %17 = sbr.rel (!%p15_p9) target bundleno = 2 (0x2), region = 108 }

</bundles_post_ra>
